<compile_context>
chip_gen: v7x
topology: tpu7x:2x2x1
jax: 0.10.0
libtpu: 0.0.40
codegen_flags: <defaults>
</compile_context>

<pallas_src>
import jax
import jax.numpy as jnp
from jax.experimental import pallas as pl
from jax.experimental.pallas import tpu as pltpu


DIM = 32        # module hyper-parameter `dim`
MAX_TM = 4096   # max packed-row tile: 4096*128*4B = 2 MiB per f32 buffer
MIN_TM = 512    # don't bother with tiles smaller than this for large problems


# ------------------------------- kernel -------------------------------------
def expo_linear_kernel(w_ref, bias_ref, x_ref, o_ref):
    # One lane-dense (TM,128) @ (128,128) matmul + bias per grid step.
    acc = jnp.dot(x_ref[...], w_ref[...], preferred_element_type=jnp.float32)
    o_ref[...] = (acc + bias_ref[...]).astype(o_ref.dtype)


# --------------------------- parameter precompute ----------------------------
def make_exponential_linear_params(angles, bias, dim, dtype=jnp.float32):
    """Per-parameter-update precompute (hoist/cache this out of the hot path).

    Returns the packed block-diagonal expm weight (lane, lane) in `dtype` and the
    packed f32 bias (1, lane).
    """
    iu, ju = jnp.triu_indices(dim, k=1)
    A = jnp.zeros((dim, dim), jnp.float32)
    A = A.at[iu, ju].set(angles.astype(jnp.float32))
    A = A.at[ju, iu].set(-angles.astype(jnp.float32))
    # Norm-adaptive scaling-and-squaring Pade == torch.linalg.matrix_exp semantics.
    W = jax.scipy.linalg.expm(A)

    # Pack `pack` feature rows into the 128-lane axis (block-diagonal weight).
    # TODO(synk): if dim does not divide 128 we fall back to pack=1 (sub-128-lane
    # masked stores) — legal but a perf cliff.
    pack = 128 // dim if 128 % dim == 0 else 1
    lane = pack * dim
    if pack > 1:
        W_block = jnp.kron(jnp.eye(pack, dtype=jnp.float32), W)
    else:
        W_block = W
    if bias is None:
        bias = jnp.zeros((dim,), jnp.float32)
    bias_l = jnp.tile(bias.astype(jnp.float32), pack).reshape(1, lane)
    return W_block.astype(dtype), bias_l, pack, lane


# ------------------------------- tiling --------------------------------------
def _choose_tile(rows_packed, max_tm=MAX_TM, min_tm=MIN_TM, target_steps=8):
    """Pick a packed-row tile: >= ~target_steps grid steps, 8-aligned, VMEM-safe."""
    full = ((rows_packed + 7) // 8) * 8            # whole problem, 8-aligned
    tm = -(-rows_packed // target_steps)
    tm = ((tm + 7) // 8) * 8
    tm = max(min_tm, tm)
    tm = min(max_tm, tm, full)
    tm = max(tm, 8)
    # Prefer an even step count (v7x: 2 TensorCores share the grid).
    steps = -(-rows_packed // tm)
    if steps > 2 and steps % 2 == 1:
        alt = ((-(-rows_packed // (steps + 1)) + 7) // 8) * 8
        if alt >= 8 and (-(-rows_packed // alt)) % 2 == 0:
            tm = alt
    return tm


# ------------------------------- apply ---------------------------------------
def exponential_linear_apply(x, W_block, bias_l, dim):
    lane = W_block.shape[0]
    pack = lane // dim
    orig_shape = x.shape
    x2d = x.reshape(-1, dim)                       # keep activation dtype
    M = x2d.shape[0]

    # Minimal pad so the packed (rows, 128) view exists and rows are 8-aligned.
    row_align = pack * 8
    M_pad = -(-M // row_align) * row_align
    if M_pad != M:
        x2d = jnp.pad(x2d, ((0, M_pad - M), (0, 0)))
    rows = M_pad // pack
    x_packed = x2d.reshape(rows, lane)             # contiguous view, no copy

    tm = _choose_tile(rows)
    grid = -(-rows // tm)                          # ragged last tile handled by Pallas

    out = pl.pallas_call(
        expo_linear_kernel,
        out_shape=jax.ShapeDtypeStruct((rows, lane), x.dtype),
        grid_spec=pl.GridSpec(
            grid=(grid,),
            in_specs=[
                pl.BlockSpec((lane, lane), lambda i: (0, 0)),   # W_block (resident)
                pl.BlockSpec((1, lane), lambda i: (0, 0)),      # bias (resident)
                pl.BlockSpec((tm, lane), lambda i: (i, 0)),     # packed x row tile
            ],
            out_specs=pl.BlockSpec((tm, lane), lambda i: (i, 0)),
        ),
        compiler_params=pltpu.CompilerParams(
            dimension_semantics=("parallel",),                  # shards across v7x TCs
        ),
    )(W_block, bias_l, x_packed)

    out = out.reshape(M_pad, dim)
    if M_pad != M:
        out = out[:M]
    return out.reshape(orig_shape)


def exponential_linear(x, angles, bias, dim):
    """Convenience one-shot path (training-style: recompute expm each call)."""
    W_block, bias_l, _, _ = make_exponential_linear_params(
        angles, bias, dim, dtype=x.dtype)
    return exponential_linear_apply(x, W_block, bias_l, dim)


# ------------------------------- self-test ------------------------------------
if __name__ == "__main__":
    key = jax.random.PRNGKey(0)
    k_angles, k_x = jax.random.split(key)

    num_params = DIM * (DIM - 1) // 2
    # deterministic parameter init mirroring the module's __init__
    angles = jax.random.normal(k_angles, (num_params,), jnp.float32) * 0.01
    bias = jnp.zeros((DIM,), jnp.float32)

    x = jax.random.normal(k_x, (2, 8, DIM), jnp.float32)   # (batch, seq, dim)

    out = jax.block_until_ready(exponential_linear(x, angles, bias, DIM))

    # pure-JAX reference (torch.linalg.matrix_exp equivalent)
    iu, ju = jnp.triu_indices(DIM, k=1)
    A_ref = (jnp.zeros((DIM, DIM), jnp.float32)
             .at[iu, ju].set(angles).at[ju, iu].set(-angles))
    W_ref = jax.scipy.linalg.expm(A_ref)
    ref = x @ W_ref + bias

    assert jnp.allclose(out, ref, atol=1e-5, rtol=1e-5), \
        float(jnp.max(jnp.abs(out - ref)))
    print("KERNEL_OK")
</pallas_src>

<mosaic_0001>
module attributes {stable_mosaic.version = 11 : i64} {
  func.func @expo_linear_kernel(%arg0: i32, %arg1: memref<128x128xf32, #tpu.memory_space<vmem>>, %arg2: memref<1x128xf32, #tpu.memory_space<vmem>>, %arg3: memref<8x128xf32, #tpu.memory_space<vmem>>, %arg4: memref<8x128xf32, #tpu.memory_space<vmem>>) attributes {dimension_semantics = [#tpu.dimension_semantics<parallel>], iteration_bounds = array<i64: 1>, scalar_prefetch = 0 : i64, scratch_operands = 0 : i64, tpu.core_type = #tpu.core_type<tc>, window_params = [{pipeline_mode = #tpu.pipeline_mode<synchronous>, transform_indices = @transform_0, window_bounds = array<i64: 128, 128>}, {pipeline_mode = #tpu.pipeline_mode<synchronous>, transform_indices = @transform_1, window_bounds = array<i64: 1, 128>}, {transform_indices = @transform_2, window_bounds = array<i64: 8, 128>}, {transform_indices = @transform_3, window_bounds = array<i64: 8, 128>}]} {
    %c0 = arith.constant 0 : index
    %c0_0 = arith.constant 0 : index
    %0 = vector.load %arg3[%c0, %c0_0] : memref<8x128xf32, #tpu.memory_space<vmem>>, vector<8x128xf32>
    %c0_1 = arith.constant 0 : index
    %c0_2 = arith.constant 0 : index
    %1 = vector.load %arg1[%c0_1, %c0_2] : memref<128x128xf32, #tpu.memory_space<vmem>>, vector<128x128xf32>
    %cst = arith.constant dense<0.000000e+00> : vector<8x128xf32>
    %2 = tpu.matmul %0, %1, %cst {dimension_numbers = #tpu.dot_dimension_numbers<[1], [0], [0], [1], [0, 0, 1, 1], [], []>} : vector<8x128xf32>, vector<128x128xf32>, vector<8x128xf32> -> vector<8x128xf32>
    %c0_3 = arith.constant 0 : index
    %c0_4 = arith.constant 0 : index
    %3 = vector.load %arg2[%c0_3, %c0_4] : memref<1x128xf32, #tpu.memory_space<vmem>>, vector<1x128xf32>
    %4 = vector.broadcast %3 : vector<1x128xf32> to vector<8x128xf32>
    %5 = arith.addf %2, %4 : vector<8x128xf32>
    %c0_5 = arith.constant 0 : index
    %c0_6 = arith.constant 0 : index
    %6 = vector.load %arg4[%c0_5, %c0_6] : memref<8x128xf32, #tpu.memory_space<vmem>>, vector<8x128xf32>
    tpu.vector_store %arg4[%c0_5, %c0_6], %5 {strides = array<i32>} : memref<8x128xf32, #tpu.memory_space<vmem>>, vector<8x128xf32>,
    return
  }
  func.func @transform_0(%arg0: i32) -> (i32, i32) {
    %c0_i32 = arith.constant 0 : i32
    %c0_i32_0 = arith.constant 0 : i32
    %c0_i32_1 = arith.constant 0 : i32
    return %c0_i32, %c0_i32_0 : i32, i32
  }
  func.func @transform_1(%arg0: i32) -> (i32, i32) {
    %c0_i32 = arith.constant 0 : i32
    %c0_i32_0 = arith.constant 0 : i32
    %c0_i32_1 = arith.constant 0 : i32
    return %c0_i32, %c0_i32_0 : i32, i32
  }
  func.func @transform_2(%arg0: i32) -> (i32, i32) {
    %c0_i32 = arith.constant 0 : i32
    %c0_i32_0 = arith.constant 0 : i32
    return %arg0, %c0_i32 : i32, i32
  }
  func.func @transform_3(%arg0: i32) -> (i32, i32) {
    %c0_i32 = arith.constant 0 : i32
    %c0_i32_0 = arith.constant 0 : i32
    return %arg0, %c0_i32 : i32, i32
  }
}

</mosaic_0001>

<bundles_post_ra>
// kernel: tpu_custom_call.1
= control target key start
LH: loop header
LB: loop body
LE: loop exit
PB: predicated region body
PF: predicated region fallthrough
CT: control target
= control target key end

     0   :  { %8 = vsyncpa [#allocation3], 0  ;;  %s376_s0 = inlined_call_operand.hbm [shape: f32[128,128], index: 0, kind: input, shape index: {}]   ;;  %s377_s1 = inlined_call_operand.vmem [shape: f32[1,128], index: 1, kind: input, shape index: {}]   ;;  %s378_s2 = inlined_call_operand.hbm [shape: f32[8,128], index: 2, kind: input, shape index: {}]   ;;  %s379_s3 = inlined_call_operand.hbm [shape: f32[8,128], index: 3, kind: output, shape index: {}]  }
   0x1   :  { %9 = vsyncpa [#allocation6], 0 }
   0x2   :  { %10 = vsyncpa [#allocation4], 0  ;;  %s309_s12 = smov [#allocation2]   ;;  %s237_s16 = scalar_lea.hbm %s376_s0, 2048 }
   0x3   :  { %s16_s13 = sshll.u32 %s309_s12, 4  ;;  %p238_p0 = scmp.ne.s32.totalorder %s376_s0, %s237_s16  ;;  %s17_s13 = int_to_ptr.vmem [resolvable:$true] %s16_s13 }
   0x4   :  { %p241_p1 = scmp.lt.u32.totalorder %s237_s16, %s376_s0 }
   0x6   :  { %p243_p2 = pnand %p241_p1, %p238_p0 }
   0x8   :  { %246 = shalt.err (!%p243_p2)
}
   0x9   :  { %s247_s21 = scalar_lea.vmem %s17_s13, 2048  ;;  %p252_p4 = scmp.lt.s32.totalorder %s17_s13, %s17_s13 }
   0xa   :  { %p248_p3 = scmp.ne.s32.totalorder %s17_s13, %s247_s21  ;;  %p253_p5 = scmp.lt.s32.totalorder %s247_s21, %s247_s21 }
   0xc   :  { %p254_p6 = por %p253_p5, %p252_p4 }
   0xe   :  { %p255_p7 = pnand %p254_p6, %p248_p3 }
  0x10   :  { %258 = shalt.err (!%p255_p7)
}
  0x11   :  { %s310_s22 = smov 128   ;;  %s311_s23 = smov 8  }
  0x12   :  { %22 = dma.hbm_to_vmem [thread:$0]  %s376_s0, 2048, %s17_s13, [#allocation3], %s310_s22, %s310_s22, %s311_s23  }
  0x13   :  { %s312_s26 = smov [#allocation5]   ;;  %s259_s30 = scalar_lea.hbm %s378_s2, 128 }
  0x14   :  { %s31_s27 = sshll.u32 %s312_s26, 4  ;;  %p260_p8 = scmp.ne.s32.totalorder %s378_s2, %s259_s30  ;;  %s32_s27 = int_to_ptr.vmem [resolvable:$true] %s31_s27 }
  0x15   :  { %p263_p9 = scmp.lt.u32.totalorder %s259_s30, %s378_s2 }
  0x17   :  { %p265_p10 = pnand %p263_p9, %p260_p8 }
  0x19   :  { %268 = shalt.err (!%p265_p10)
}
  0x1a   :  { %s269_s8 = scalar_lea.vmem %s32_s27, 128  ;;  %p274_p12 = scmp.lt.s32.totalorder %s32_s27, %s32_s27 }
  0x1b   :  { %p270_p11 = scmp.ne.s32.totalorder %s32_s27, %s269_s8  ;;  %p275_p13 = scmp.lt.s32.totalorder %s269_s8, %s269_s8 }
  0x1d   :  { %p276_p0 = por %p275_p13, %p274_p12 }
  0x1f   :  { %p277_p1 = pnand %p276_p0, %p270_p11 }
  0x21   :  { %280 = shalt.err (!%p277_p1)
}
  0x22   :  { %34 = dma.hbm_to_vmem [thread:$0]  %s378_s2, 128, %s32_s27, [#allocation6]  }
  0x23   :  { %303 = dma.done.wait [#allocation3], 2048  }
  0x24   :  { %304 = vsyncadd [#allocation3], 4294965248 }
  0x25   :  { %305 = dma.done.wait [#allocation6], 128  }
  0x26   :  { %306 = vsyncadd [#allocation6], 4294967168  ;;  %v313_v0 = vmov 0.0|0.0   ;;  %vm314_vm0 = vmmov 0   ;;  %v315_v1 = vmov 0.0   ;;  %v42_v2 = vld [vmem:[#allocation2] sm:$0xff] }
  0x27   :  { %205 = vmatprep.subr.bf16.mxu0 %v313_v0  ;;  %202 = vmatprep.mubr.msk.f32.mxu0 %vm314_vm0, %v315_v1  ;;  %v43_v3 = vld [vmem:[#allocation2 + $0x8] sm:$0xff]  ;;  %v44_v4 = vld [vmem:[#allocation2 + $0x10] sm:$0xff]  ;;  %v45_v6 = vld [vmem:[#allocation2 + $0x18] sm:$0xff]  ;;  %s316_s11 = smov [#allocation7]  }
  0x28   :  { %v206_v5 = vpack.c.bf16 %v43_v3, %v42_v2  ;;  %v209_v7 = vpack.c.bf16 %v45_v6, %v44_v4  ;;  %v46_v8 = vld [vmem:[#allocation2 + $0x20] sm:$0xff]  ;;  %v47_v9 = vld [vmem:[#allocation2 + $0x28] sm:$0xff]  ;;  %v48_v11 = vld [vmem:[#allocation2 + $0x30] sm:$0xff]  ;;  %s142_s12 = sshll.u32 %s316_s11, 4  ;;  %s143_s12 = int_to_ptr.vmem [resolvable:$true] %s142_s12 }
  0x29   :  { %v212_v10 = vpack.c.bf16 %v47_v9, %v46_v8  ;;  %v49_v12 = vld [vmem:[#allocation2 + $0x38] sm:$0xff]  ;;  %v50_v14 = vld [vmem:[#allocation2 + $0x40] sm:$0xff]  ;;  %v51_v15 = vld [vmem:[#allocation2 + $0x48] sm:$0xff]  ;;  %s281_s13 = scalar_lea.vmem %s143_s12, 128  ;;  %p286_p3 = scmp.lt.s32.totalorder %s143_s12, %s143_s12 }
  0x2a   :  { %207 = vmatpush3.bf16.msra.mxu0 %v206_v5  ;;  %v215_v13 = vpack.c.bf16 %v49_v12, %v48_v11  ;;  %v218_v16 = vpack.c.bf16 %v51_v15, %v50_v14  ;;  %v52_v17 = vld [vmem:[#allocation2 + $0x50] sm:$0xff]  ;;  %v53_v18 = vld [vmem:[#allocation2 + $0x58] sm:$0xff]  ;;  %v54_v20 = vld [vmem:[#allocation2 + $0x60] sm:$0xff]  ;;  %p282_p2 = scmp.ne.s32.totalorder %s143_s12, %s281_s13  ;;  %p287_p4 = scmp.lt.s32.totalorder %s281_s13, %s281_s13 }
  0x2b   :  { %208 = vmatprep.subr.bf16.mxu0 %v313_v0  ;;  %v221_v19 = vpack.c.bf16 %v53_v18, %v52_v17  ;;  %v55_v21 = vld [vmem:[#allocation2 + $0x68] sm:$0xff]  ;;  %v56_v23 = vld [vmem:[#allocation2 + $0x70] sm:$0xff]  ;;  %v57_v24 = vld [vmem:[#allocation2 + $0x78] sm:$0xff] }
  0x2c   :  { %v224_v22 = vpack.c.bf16 %v55_v21, %v54_v20  ;;  %v227_v25 = vpack.c.bf16 %v57_v24, %v56_v23  ;;  %v41_v26 = vld [vmem:[#allocation5] sm:$0xff]  ;;  %p288_p5 = por %p287_p4, %p286_p3 }
  0x2d   :  { %v152_v27 = vld [vmem:[%s377_s1] ss:$0 sm:$0xff] }
  0x2e   :  { %210 = vmatpush3.bf16.msra.mxu0 %v209_v7  ;;  %p289_p6 = pnand %p288_p5, %p282_p2 }
  0x2f   :  { %211 = vmatprep.subr.bf16.mxu0 %v313_v0 }
  0x32   :  { %213 = vmatpush3.bf16.msra.mxu0 %v212_v10 }
  0x33   :  { %214 = vmatprep.subr.bf16.mxu0 %v313_v0 }
  0x36   :  { %216 = vmatpush3.bf16.msra.mxu0 %v215_v13 }
  0x37   :  { %217 = vmatprep.subr.bf16.mxu0 %v313_v0 }
  0x3a   :  { %219 = vmatpush3.bf16.msra.mxu0 %v218_v16 }
  0x3b   :  { %220 = vmatprep.subr.bf16.mxu0 %v313_v0 }
  0x3e   :  { %222 = vmatpush3.bf16.msra.mxu0 %v221_v19 }
  0x3f   :  { %223 = vmatprep.subr.bf16.mxu0 %v313_v0 }
  0x42   :  { %225 = vmatpush3.bf16.msra.mxu0 %v224_v22 }
  0x43   :  { %226 = vmatprep.subr.bf16.mxu0 %v313_v0 }
  0x46   :  { %228 = vmatpush3.bf16.msra.mxu0 %v227_v25 }
  0x49   :  { %203 = vmatmul.mubr.f32.vlgmr.msra.gmra.mrb[0].mxu0 %v41_v26 }
 0x11c   :  { %v131_v28 = vpop.f32.mrb[0].mxu0 }
 0x11d   :  { %v132_v29 = vadd.f32 %v152_v27, %v131_v28  ;;  %v204_v30 = vpop.f32.mrb[1].mxu0 }
 0x11f   :  { %135 = vst [vmem:[#allocation7] sm:$0xff] %v132_v29 }
 0x120   :  { %292 = shalt.err (!%p289_p6)
}
 0x121   :  { %s293_s16 = scalar_lea.hbm %s379_s3, 128 }
 0x122   :  { %p294_p7 = scmp.ne.s32.totalorder %s379_s3, %s293_s16  ;;  %p297_p8 = scmp.lt.u32.totalorder %s293_s16, %s379_s3 }
 0x124   :  { %p299_p9 = pnand %p297_p8, %p294_p7 }
 0x126   :  { %302 = shalt.err (!%p299_p9)
}
 0x127   :  { %145 = dma.vmem_to_hbm [thread:$0]  %s143_s12, 128, %s379_s3, [#allocation4]  }
 0x128   :  { %307 = dma.done.wait [#allocation4], 128  }
 0x129   :  { %308 = vsyncadd [#allocation4], 4294967168 }
 0x12a   :  { %149 = vsyncpa [#allocation3], 1 }
 0x12b   :  { %150 = vsyncpa [#allocation6], 1 }
 0x12c   :  { %151 = vsyncpa [#allocation4], 1 }

</bundles_post_ra>
